<compile_context>
chip_gen: v6e
topology: v6e:2x2x1
jax: 0.10.0
libtpu: 0.0.40
codegen_flags: <defaults>
</compile_context>

<pallas_src>
import jax
import jax.numpy as jnp
from jax import lax
from jax.experimental import pallas as pl
from jax.experimental.pallas import tpu as pltpu


def _self_output_kernel(eps, inv_h):
    def kernel(x_ref, res_ref, w_ref, b_ref, gamma_ref, beta_ref, o_ref):
        # Dense: y = x @ W + b  (MXU, native-dtype operands, f32 accumulate)
        y = jnp.dot(x_ref[...], w_ref[...], preferred_element_type=jnp.float32)
        y = y + b_ref[...].astype(jnp.float32)

        # Dropout: module is evaluated in inference mode -> identity.
        # TODO(synk): training-mode dropout (pltpu.prng_random_bits mask) not emitted.

        # Residual add (f32)
        z = y + res_ref[...].astype(jnp.float32)

        # LayerNorm over hidden (last) axis, biased variance, eps inside rsqrt.
        # Use sum * (1/H) so the reduction feeds a cheap scalar-constant scale.
        u = jnp.sum(z, axis=-1, keepdims=True) * inv_h
        zc = z - u
        s = jnp.sum(zc * zc, axis=-1, keepdims=True) * inv_h
        norm = zc * lax.rsqrt(s + eps)

        out = (gamma_ref[...].astype(jnp.float32) * norm
               + beta_ref[...].astype(jnp.float32))
        o_ref[...] = out.astype(o_ref.dtype)

    return kernel


def _choose_tm(R, H, itemsize, vmem_budget_bytes=12 * 1024 * 1024):
    """Pick a row-tile size that fits a conservative VMEM budget.

    Budget accounts for double-buffered x / residual / output blocks plus the
    resident (H, H) weight (counted twice for buffering headroom). Conservative
    enough for v5e's 16 MiB default scoped VMEM.
    """
    if R <= 512:
        return R  # single tile (block == full array dim is always legal)
    avail = vmem_budget_bytes - 2 * H * H * itemsize
    if avail <= 0:
        # Weight alone blows the budget (very large H); fall back to a small
        # row tile and rely on the default scoped limit.
        # TODO(synk): add a K-reduction grid axis + f32 accumulator for H >= 4096.
        return 128
    # 6 = 3 row-tiled arrays (x, residual, out) x 2 pipeline buffers each.
    tm = avail // (6 * H * itemsize)
    tm = int(min(tm, 1024, R))
    tm = (tm // 8) * 8  # keep second-to-last block dim a multiple of 8
    return max(tm, 8)


def self_output_forward(hidden_states, input_tensor, weight, bias, gamma, beta,
                        eps=1e-12):
    """hidden_states, input_tensor: (B, S, H). weight: (H_in, H_out) = torch W^T."""
    B, S, H = hidden_states.shape
    R = B * S
    x2 = hidden_states.reshape(R, H)
    r2 = input_tensor.reshape(R, H)
    b2 = bias.reshape(1, H)
    g2 = gamma.reshape(1, H)
    be2 = beta.reshape(1, H)

    itemsize = jnp.dtype(hidden_states.dtype).itemsize
    TM = _choose_tm(R, H, itemsize)
    grid = (pl.cdiv(R, TM),)

    act_bytes = jnp.dtype(hidden_states.dtype).itemsize
    cost = pl.CostEstimate(
        flops=2 * R * H * H,
        transcendentals=R,                                   # one rsqrt per row
        bytes_accessed=3 * R * H * act_bytes + H * H * jnp.dtype(weight.dtype).itemsize,
    )

    out = pl.pallas_call(
        _self_output_kernel(float(eps), 1.0 / float(H)),
        out_shape=jax.ShapeDtypeStruct((R, H), hidden_states.dtype),
        grid_spec=pltpu.PrefetchScalarGridSpec(
            num_scalar_prefetch=0,
            grid=grid,
            in_specs=[
                pl.BlockSpec((TM, H), lambda i: (i, 0)),   # x (row-tiled)
                pl.BlockSpec((TM, H), lambda i: (i, 0)),   # residual (row-tiled)
                pl.BlockSpec((H, H), lambda i: (0, 0)),    # weight (VMEM-resident)
                pl.BlockSpec((1, H), lambda i: (0, 0)),    # bias
                pl.BlockSpec((1, H), lambda i: (0, 0)),    # gamma
                pl.BlockSpec((1, H), lambda i: (0, 0)),    # beta
            ],
            out_specs=pl.BlockSpec((TM, H), lambda i: (i, 0)),
        ),
        compiler_params=pltpu.CompilerParams(
            dimension_semantics=("parallel",)),              # v7x: 2 TCs share rows
        cost_estimate=cost,
    )(x2, r2, weight, b2, g2, be2)

    return out.reshape(B, S, H)


if __name__ == "__main__":
    # Small shapes: batch=2, seq=8, hidden=32 (toy; real configs should use H % 128 == 0)
    B, S, H = 2, 8, 32
    key = jax.random.PRNGKey(0)
    k_x, k_r, k_w, k_b = jax.random.split(key, 4)

    hidden_states = jax.random.normal(k_x, (B, S, H), dtype=jnp.float32)
    input_tensor = jax.random.normal(k_r, (B, S, H), dtype=jnp.float32)

    # Deterministic parameter init (mimics nn.Linear uniform(-1/sqrt(H), 1/sqrt(H)))
    bound = 1.0 / (H ** 0.5)
    weight = jax.random.uniform(k_w, (H, H), minval=-bound, maxval=bound,
                                dtype=jnp.float32)   # stored as (in, out) = W^T
    bias = jax.random.uniform(k_b, (H,), minval=-bound, maxval=bound,
                              dtype=jnp.float32)
    gamma = jnp.ones((H,), dtype=jnp.float32)
    beta = jnp.zeros((H,), dtype=jnp.float32)

    out = self_output_forward(hidden_states, input_tensor, weight, bias, gamma, beta)
    jax.block_until_ready(out)

    # Pure-JAX reference check
    y_ref = hidden_states.reshape(-1, H) @ weight + bias
    z_ref = y_ref + input_tensor.reshape(-1, H)
    u = z_ref.mean(-1, keepdims=True)
    s = ((z_ref - u) ** 2).mean(-1, keepdims=True)
    ref = (gamma * (z_ref - u) / jnp.sqrt(s + 1e-12) + beta).reshape(B, S, H)
    assert jnp.allclose(out, ref, atol=1e-5, rtol=1e-5), "mismatch vs reference"

    print("KERNEL_OK")
</pallas_src>

<mosaic_0001>
module attributes {stable_mosaic.version = 11 : i64} {
  func.func @kernel(%arg0: i32, %arg1: memref<16x32xf32, #tpu.memory_space<vmem>>, %arg2: memref<16x32xf32, #tpu.memory_space<vmem>>, %arg3: memref<32x32xf32, #tpu.memory_space<vmem>>, %arg4: memref<1x32xf32, #tpu.memory_space<vmem>>, %arg5: memref<1x32xf32, #tpu.memory_space<vmem>>, %arg6: memref<1x32xf32, #tpu.memory_space<vmem>>, %arg7: memref<16x32xf32, #tpu.memory_space<vmem>>) attributes {dimension_semantics = [#tpu.dimension_semantics<parallel>], iteration_bounds = array<i64: 1>, scalar_prefetch = 0 : i64, scratch_operands = 0 : i64, tpu.core_type = #tpu.core_type<tc>, window_params = [{transform_indices = @transform_0, window_bounds = array<i64: 16, 32>}, {transform_indices = @transform_1, window_bounds = array<i64: 16, 32>}, {pipeline_mode = #tpu.pipeline_mode<synchronous>, transform_indices = @transform_2, window_bounds = array<i64: 32, 32>}, {pipeline_mode = #tpu.pipeline_mode<synchronous>, transform_indices = @transform_3, window_bounds = array<i64: 1, 32>}, {pipeline_mode = #tpu.pipeline_mode<synchronous>, transform_indices = @transform_4, window_bounds = array<i64: 1, 32>}, {pipeline_mode = #tpu.pipeline_mode<synchronous>, transform_indices = @transform_5, window_bounds = array<i64: 1, 32>}, {transform_indices = @transform_6, window_bounds = array<i64: 16, 32>}]} {
    %c0 = arith.constant 0 : index
    %c0_0 = arith.constant 0 : index
    %0 = vector.load %arg1[%c0, %c0_0] : memref<16x32xf32, #tpu.memory_space<vmem>>, vector<16x32xf32>
    %c0_1 = arith.constant 0 : index
    %c0_2 = arith.constant 0 : index
    %1 = vector.load %arg3[%c0_1, %c0_2] : memref<32x32xf32, #tpu.memory_space<vmem>>, vector<32x32xf32>
    %cst = arith.constant dense<0.000000e+00> : vector<16x32xf32>
    %2 = tpu.matmul %0, %1, %cst {dimension_numbers = #tpu.dot_dimension_numbers<[1], [0], [0], [1], [0, 0, 1, 1], [], []>} : vector<16x32xf32>, vector<32x32xf32>, vector<16x32xf32> -> vector<16x32xf32>
    %c0_3 = arith.constant 0 : index
    %c0_4 = arith.constant 0 : index
    %3 = vector.load %arg4[%c0_3, %c0_4] : memref<1x32xf32, #tpu.memory_space<vmem>>, vector<1x32xf32>
    %4 = vector.broadcast %3 : vector<1x32xf32> to vector<16x32xf32>
    %5 = arith.addf %2, %4 : vector<16x32xf32>
    %c0_5 = arith.constant 0 : index
    %c0_6 = arith.constant 0 : index
    %6 = vector.load %arg2[%c0_5, %c0_6] : memref<16x32xf32, #tpu.memory_space<vmem>>, vector<16x32xf32>
    %7 = arith.addf %5, %6 : vector<16x32xf32>
    %cst_7 = arith.constant dense<0.000000e+00> : vector<16xf32>
    %8 = vector.multi_reduction <add>, %7, %cst_7 [1] : vector<16x32xf32> to vector<16xf32>
    %9 = vector.shape_cast %8 : vector<16xf32> to vector<16x1xf32>
    %cst_8 = arith.constant 3.125000e-02 : f32
    %10 = vector.broadcast %cst_8 : f32 to vector<16x1xf32>
    %11 = arith.mulf %9, %10 : vector<16x1xf32>
    %12 = vector.broadcast %11 : vector<16x1xf32> to vector<16x32xf32>
    %13 = arith.subf %7, %12 : vector<16x32xf32>
    %14 = arith.mulf %13, %13 : vector<16x32xf32>
    %cst_9 = arith.constant dense<0.000000e+00> : vector<16xf32>
    %15 = vector.multi_reduction <add>, %14, %cst_9 [1] : vector<16x32xf32> to vector<16xf32>
    %16 = vector.shape_cast %15 : vector<16xf32> to vector<16x1xf32>
    %cst_10 = arith.constant 3.125000e-02 : f32
    %17 = vector.broadcast %cst_10 : f32 to vector<16x1xf32>
    %18 = arith.mulf %16, %17 : vector<16x1xf32>
    %cst_11 = arith.constant 9.99999996E-13 : f32
    %19 = vector.broadcast %cst_11 : f32 to vector<16x1xf32>
    %20 = arith.addf %18, %19 : vector<16x1xf32>
    %21 = math.rsqrt %20 : vector<16x1xf32>
    %22 = vector.broadcast %21 : vector<16x1xf32> to vector<16x32xf32>
    %23 = arith.mulf %13, %22 : vector<16x32xf32>
    %c0_12 = arith.constant 0 : index
    %c0_13 = arith.constant 0 : index
    %24 = vector.load %arg5[%c0_12, %c0_13] : memref<1x32xf32, #tpu.memory_space<vmem>>, vector<1x32xf32>
    %25 = vector.broadcast %24 : vector<1x32xf32> to vector<16x32xf32>
    %26 = arith.mulf %25, %23 : vector<16x32xf32>
    %c0_14 = arith.constant 0 : index
    %c0_15 = arith.constant 0 : index
    %27 = vector.load %arg6[%c0_14, %c0_15] : memref<1x32xf32, #tpu.memory_space<vmem>>, vector<1x32xf32>
    %28 = vector.broadcast %27 : vector<1x32xf32> to vector<16x32xf32>
    %29 = arith.addf %26, %28 : vector<16x32xf32>
    %c0_16 = arith.constant 0 : index
    %c0_17 = arith.constant 0 : index
    %30 = vector.load %arg7[%c0_16, %c0_17] : memref<16x32xf32, #tpu.memory_space<vmem>>, vector<16x32xf32>
    tpu.vector_store %arg7[%c0_16, %c0_17], %29 {strides = array<i32>} : memref<16x32xf32, #tpu.memory_space<vmem>>, vector<16x32xf32>,
    return
  }
  func.func @transform_0(%arg0: i32) -> (i32, i32) {
    %c0_i32 = arith.constant 0 : i32
    %c0_i32_0 = arith.constant 0 : i32
    return %arg0, %c0_i32 : i32, i32
  }
  func.func @transform_1(%arg0: i32) -> (i32, i32) {
    %c0_i32 = arith.constant 0 : i32
    %c0_i32_0 = arith.constant 0 : i32
    return %arg0, %c0_i32 : i32, i32
  }
  func.func @transform_2(%arg0: i32) -> (i32, i32) {
    %c0_i32 = arith.constant 0 : i32
    %c0_i32_0 = arith.constant 0 : i32
    %c0_i32_1 = arith.constant 0 : i32
    return %c0_i32, %c0_i32_0 : i32, i32
  }
  func.func @transform_3(%arg0: i32) -> (i32, i32) {
    %c0_i32 = arith.constant 0 : i32
    %c0_i32_0 = arith.constant 0 : i32
    %c0_i32_1 = arith.constant 0 : i32
    return %c0_i32, %c0_i32_0 : i32, i32
  }
  func.func @transform_4(%arg0: i32) -> (i32, i32) {
    %c0_i32 = arith.constant 0 : i32
    %c0_i32_0 = arith.constant 0 : i32
    %c0_i32_1 = arith.constant 0 : i32
    return %c0_i32, %c0_i32_0 : i32, i32
  }
  func.func @transform_5(%arg0: i32) -> (i32, i32) {
    %c0_i32 = arith.constant 0 : i32
    %c0_i32_0 = arith.constant 0 : i32
    %c0_i32_1 = arith.constant 0 : i32
    return %c0_i32, %c0_i32_0 : i32, i32
  }
  func.func @transform_6(%arg0: i32) -> (i32, i32) {
    %c0_i32 = arith.constant 0 : i32
    %c0_i32_0 = arith.constant 0 : i32
    return %arg0, %c0_i32 : i32, i32
  }
}

</mosaic_0001>

<bundles_post_ra>
// kernel: tpu_custom_call.1
= control target key start
LH: loop header
LB: loop body
LE: loop exit
PB: predicated region body
PF: predicated region fallthrough
CT: control target
= control target key end

     0   :  { %11 = vsyncpa [#allocation3], 0  ;;  %s428_s0 = inlined_call_operand.hbm [shape: f32[16,32], index: 0, kind: input, shape index: {}]   ;;  %s429_s1 = inlined_call_operand.hbm [shape: f32[16,32], index: 1, kind: input, shape index: {}]   ;;  %s430_s2 = inlined_call_operand.hbm [shape: f32[32,32], index: 2, kind: input, shape index: {}]   ;;  %s431_s3 = inlined_call_operand.vmem [shape: f32[1,32], index: 3, kind: input, shape index: {}]   ;;  %s432_s4 = inlined_call_operand.vmem [shape: f32[1,32], index: 4, kind: input, shape index: {}]   ;;  %s433_s5 = inlined_call_operand.vmem [shape: f32[1,32], index: 5, kind: input, shape index: {}]   ;;  %s434_s6 = inlined_call_operand.hbm [shape: f32[16,32], index: 6, kind: output, shape index: {}]  }
   0x1   :  { %12 = vsyncpa [#allocation6], 0 }
   0x2   :  { %13 = vsyncpa [#allocation4], 0  ;;  %s346_s21 = smov [#allocation5]   ;;  %s347_s23 = smov [#allocation2]  }
   0x3   :  { %s31_s22 = sshll.u32 %s346_s21, 4  ;;  %s19_s24 = sshll.u32 %s347_s23, 4  ;;  %s32_s22 = int_to_ptr.vmem [resolvable:$true] %s31_s22  ;;  %s20_s24 = int_to_ptr.vmem [resolvable:$true] %s19_s24 }
   0x4   :  { %s268_s25 = scalar_lea.vmem %s32_s22, 256  ;;  %p273_p1 = scmp.lt.s32.totalorder %s32_s22, %s32_s22 }
   0x5   :  { %p269_p0 = scmp.ne.s32.totalorder %s32_s22, %s268_s25  ;;  %p274_p2 = scmp.lt.s32.totalorder %s268_s25, %s268_s25 }
   0x7   :  { %p275_p3 = por %p274_p2, %p273_p1 }
   0x9   :  { %p276_p4 = pnand %p275_p3, %p269_p0 }
   0xb   :  { %279 = shalt.err (!%p276_p4)
}
   0xc   :  { %s348_s26 = smov 128   ;;  %s349_s27 = smov 8  }
   0xd   :  { %37 = dma.hbm_to_vmem [thread:$0]  %s429_s1, 256, %s32_s22, [#allocation6], %s348_s26, %s348_s26, %s349_s27  }
   0xe   :  { %s288_s30 = scalar_lea.vmem %s20_s24, 256  ;;  %p293_p6 = scmp.lt.s32.totalorder %s20_s24, %s20_s24 }
   0xf   :  { %p289_p5 = scmp.ne.s32.totalorder %s20_s24, %s288_s30  ;;  %p294_p7 = scmp.lt.s32.totalorder %s288_s30, %s288_s30 }
  0x11   :  { %p295_p8 = por %p294_p7, %p293_p6 }
  0x13   :  { %p296_p9 = pnand %p295_p8, %p289_p5 }
  0x15   :  { %299 = shalt.err (!%p296_p9)
}
  0x16   :  { %25 = dma.hbm_to_vmem [thread:$0]  %s428_s0, 256, %s20_s24, [#allocation3], %s348_s26, %s348_s26, %s349_s27  }
  0x17   :  { %s350_s9 = smov [#allocation7]  }
  0x18   :  { %s43_s10 = sshll.u32 %s350_s9, 4  ;;  %s44_s10 = int_to_ptr.vmem [resolvable:$true] %s43_s10 }
  0x19   :  { %s308_s11 = scalar_lea.vmem %s44_s10, 512  ;;  %p313_p11 = scmp.lt.s32.totalorder %s44_s10, %s44_s10 }
  0x1a   :  { %p309_p10 = scmp.ne.s32.totalorder %s44_s10, %s308_s11  ;;  %p314_p12 = scmp.lt.s32.totalorder %s308_s11, %s308_s11 }
  0x1c   :  { %p315_p13 = por %p314_p12, %p313_p11 }
  0x1e   :  { %p316_p0 = pnand %p315_p13, %p309_p10 }
  0x20   :  { %319 = shalt.err (!%p316_p0)
}
  0x21   :  { %49 = dma.hbm_to_vmem [thread:$0]  %s430_s2, 512, %s44_s10, [#allocation6], %s348_s26, %s348_s26, %s349_s27  }
  0x22   :  { %340 = dma.done.wait [#allocation3], 256  }
  0x23   :  { %341 = vsyncadd [#allocation3], 4294967040 }
  0x24   :  { %342 = dma.done.wait [#allocation6], 768  }
  0x25   :  { %343 = vsyncadd [#allocation6], 4294966528  ;;  %vm78_vm0 = vcmask 261120   ;;  %v70_v0 = vld [vmem:[#allocation7 + $0x18] sm:$0xff]  ;;  %v69_v1 = vld [vmem:[#allocation7 + $0x10] sm:$0xff]  ;;  %s351_s16 = smov [#allocation8]  }
  0x26   :  { %239 = vmatprep.subr.mxu0 %v70_v0  ;;  %v65_v2 = vld [vmem:[#allocation2] sm:$0xff]  ;;  %v68_v3 = vld [vmem:[#allocation7 + $0x8] sm:$0xff]  ;;  %v160_v9 = vld [vmem:[#allocation5] sm:$0xff]  ;;  %s215_s17 = sshll.u32 %s351_s16, 4  ;;  %s216_s17 = int_to_ptr.vmem [resolvable:$true] %s215_s17 }
  0x27   :  { %240 = vmatpush3.msra.mxu0 %v70_v0  ;;  %247 = vmatprep.mubr.msk.f32.mxu0 %vm78_vm0, %v65_v2  ;;  %v67_v4 = vld [vmem:[#allocation7] sm:$0xff]  ;;  %v66_v5 = vld [vmem:[#allocation2 + $0x8] sm:$0xff]  ;;  %v161_v12 = vld [vmem:[#allocation5 + $0x8] sm:$0xff]  ;;  %s320_s18 = scalar_lea.vmem %s216_s17, 256  ;;  %p325_p2 = scmp.lt.s32.totalorder %s216_s17, %s216_s17 }
  0x28   :  { %241 = vmatprep.subr.mxu0 %v69_v1  ;;  %v228_v7 = vld [vmem:[%s431_s3] ss:$0 sm:$0xff]  ;;  %p321_p1 = scmp.ne.s32.totalorder %s216_s17, %s320_s18  ;;  %p326_p3 = scmp.lt.s32.totalorder %s320_s18, %s320_s18 }
  0x29   :  { %242 = vmatpush3.msra.mxu0 %v69_v1  ;;  %v231_v34 = vld [vmem:[%s432_s4] ss:$0 sm:$0xff] }
  0x2a   :  { %243 = vmatprep.subr.mxu0 %v68_v3  ;;  %v232_v36 = vld [vmem:[%s433_s5] ss:$0 sm:$0xff]  ;;  %p327_p4 = por %p326_p3, %p325_p2 }
  0x2b   :  { %244 = vmatpush3.msra.mxu0 %v68_v3 }
  0x2c   :  { %245 = vmatprep.subr.mxu0 %v67_v4  ;;  %p328_p5 = pnand %p327_p4, %p321_p1 }
  0x2d   :  { %246 = vmatpush3.msra.mxu0 %v67_v4 }
  0x2e   :  { %248 = vmatmul.mubr.msk.f32.vlgmr.msra.gmra.mxu0 %vm78_vm0, %v66_v5 }
  0xee   :  { %v249_v6 = vpop.f32.mrf.mxu0 }
  0xef   :  { %v157_v10 = vadd.f32 %v249_v6, %v228_v7 }
  0xf0   :  { %v151_v8 = vpop.f32.mrf.mxu0 }
  0xf1   :  { %v152_v11 = vadd.f32 %v228_v7, %v151_v8  ;;  %v163_v15 = vadd.f32 %v161_v12, %v157_v10 }
  0xf3   :  { %v162_v13 = vadd.f32 %v160_v9, %v152_v11  ;;  %v167_v16 = vsel %vm78_vm0, %v163_v15, 0.0 }
  0xf5   :  { %v164_v14 = vsel %vm78_vm0, %v162_v13, 0.0 }
  0xf6   :  { %165 = vadd.xlane.f32.xlu0 %v164_v14 }
  0xfa   :  { %168 = vadd.xlane.f32.xlu0 %v167_v16 }
 0x17f   :  { %v166_v17 = vpop.xlane.xlu0 %165 }
 0x180   :  { %v170_v18 = vmul.f32 0.03125, %v166_v17 }
 0x182   :  { %v172_v19 = vsub.f32 %v162_v13, %v170_v18 }
 0x183   :  { %v169_v20 = vpop.xlane.xlu0 %168 }
 0x184   :  { %v171_v21 = vmul.f32 0.03125, %v169_v20  ;;  %v174_v22 = vmul.f32 %v172_v19, %v172_v19 }
 0x186   :  { %v173_v23 = vsub.f32 %v163_v15, %v171_v21  ;;  %v176_v24 = vsel %vm78_vm0, %v174_v22, 0.0 }
 0x187   :  { %177 = vadd.xlane.f32.xlu1 %v176_v24 }
 0x188   :  { %v175_v25 = vmul.f32 %v173_v23, %v173_v23 }
 0x18a   :  { %v179_v26 = vsel %vm78_vm0, %v175_v25, 0.0 }
 0x18b   :  { %180 = vadd.xlane.f32.xlu1 %v179_v26 }
 0x210   :  { %v178_v27 = vpop.xlane.xlu1 %177 }
 0x211   :  { %v182_v28 = vmul.f32 0.03125, %v178_v27 }
 0x213   :  { %v184_v29 = vadd.f32 1e-12, %v182_v28 }
 0x214   :  { %v181_v30 = vpop.xlane.xlu1 %180 }
 0x215   :  { %256 = vrsqrt.f32 %v184_v29  ;;  %v183_v31 = vmul.f32 0.03125, %v181_v30 }
 0x217   :  { %v185_v32 = vadd.f32 1e-12, %v183_v31 }
 0x219   :  { %258 = vrsqrt.f32 %v185_v32 }
 0x222   :  { %v257_v33 = vpop.eup %256 }
 0x223   :  { %v188_v35 = vmul.f32 %v257_v33, %v172_v19 }
 0x225   :  { %v197_v37 = vmul.f32 %v231_v34, %v188_v35 }
 0x226   :  { %v259_v38 = vpop.eup %258 }
 0x227   :  { %v189_v39 = vmul.f32 %v259_v38, %v173_v23  ;;  %v206_v40 = vadd.f32 %v232_v36, %v197_v37 }
 0x229   :  { %v198_v41 = vmul.f32 %v231_v34, %v189_v39  ;;  %208 = vst.msk [vmem:[#allocation8] sm:$0xff] %vm78_vm0, %v206_v40 }
 0x22b   :  { %v207_v42 = vadd.f32 %v232_v36, %v198_v41 }
 0x22d   :  { %209 = vst.msk [vmem:[#allocation8 + $0x8] sm:$0xff] %vm78_vm0, %v207_v42 }
 0x22e   :  { %331 = shalt.err (!%p328_p5)
}
 0x22f   :  { %221 = dma.vmem_to_hbm [thread:$0]  %s216_s17, 256, %s434_s6, [#allocation4], %s348_s26, %s348_s26, %s349_s27  }
 0x230   :  { %344 = dma.done.wait [#allocation4], 256  }
 0x231   :  { %345 = vsyncadd [#allocation4], 4294967040 }
 0x232   :  { %225 = vsyncpa [#allocation3], 1 }
 0x233   :  { %226 = vsyncpa [#allocation6], 1 }
 0x234   :  { %227 = vsyncpa [#allocation4], 1 }

</bundles_post_ra>
